<compile_context>
chip_gen: v7x
topology: tpu7x:2x2x1
jax: 0.10.0
libtpu: 0.0.40
codegen_flags: <defaults>
</compile_context>

<pallas_src>
import functools

import jax
import jax.numpy as jnp
import numpy as np
from jax import lax
from jax.experimental import pallas as pl
from jax.experimental.pallas import tpu as pltpu

_GUARD = 16  # zero-guard rows on each side of the padded conv scratch


def _gelu(x, use_tanh):
    if use_tanh:
        # tanh approximation -> EUP slot (opt-in; does not exactly match
        # nn.GELU(approximate='none')).
        return 0.5 * x * (1.0 + jnp.tanh(0.7978845608028654 * (x + 0.044715 * x * x * x)))
    # nn.GELU() default (approximate='none'): 0.5*x*(1 + erf(x/sqrt(2)))
    return 0.5 * x * (1.0 + lax.erf(x * 0.7071067811865476))


def _msmu_kernel(W, R, use_tanh_gelu,
                 xm_ref, xt_ref, xb_ref,
                 w1c_ref, w1g_ref, b1c_ref, b1g_ref,
                 dww_ref, dwb_ref, w2t_ref, wskt_ref, bf_ref,
                 o_ref, xh_pad):
    """One (batch, row-tile) step.

    xm_ref : (1, R*W, Cin) bf16   interior tokens of this row tile
    xt_ref : (1, W, Cin)   bf16   image row above the tile (clamped at r==0)
    xb_ref : (1, W, Cin)   bf16   image row below the tile (clamped at r==last)
    w1c/w1g: (Cin, HF)     bf16   fc1 weight, pre-split content / gate halves
    b1c/b1g: (1, HF)       f32
    dww    : (9, HF)       f32    depthwise 3x3 weights, k = ky*3 + kx
    dwb    : (1, HF)       f32
    w2t    : (HF,  Cout_pad) bf16   fc2 weight (transposed, lane-padded)
    wskt   : (Cin, Cout_pad) bf16   1x1-skip weight (transposed, lane-padded)
    bf     : (1, Cout_pad)   f32    fused bias (b2 + b_skip, lane-padded)
    o_ref  : (1, R*W, Cout_pad) bf16
    xh_pad : VMEM scratch (2*GUARD + 2*W + R*W, HF) padded conv input
    """
    r = pl.program_id(1)
    nr = pl.num_programs(1)
    M = R * W
    HF = w1c_ref.shape[1]
    P = _GUARD + W                                   # interior start (mult. of 8)

    xm = xm_ref[0]                                   # (M, Cin) bf16
    w1c = w1c_ref[...]                               # (Cin, HF) bf16
    b1c = b1c_ref[...]                               # (1, HF)  f32

    # Fused fc1 "content" for [top halo | interior | bottom halo] in a single
    # MXU pass (sublane stack; all row counts are multiples of 8).
    x_all = jnp.concatenate([xt_ref[0], xm, xb_ref[0]], axis=0)       # (M+2W, Cin)
    xh_all = jnp.dot(x_all, w1c, preferred_element_type=jnp.float32) + b1c
    # Conv zero-padding at the image top/bottom: zero the halo rows there.
    # (These zeros are load-bearing; the conv taps read them directly.)
    row = lax.broadcasted_iota(jnp.int32, (M + 2 * W, 1), 0)
    keep = jnp.logical_and(jnp.logical_or(row >= W, r > 0),
                           jnp.logical_or(row < W + M, r < nr - 1))
    xh_all = jnp.where(keep, xh_all, 0.0)

    sdt = xh_pad.dtype
    zg = jnp.zeros((_GUARD, HF), sdt)
    xh_pad[pl.ds(0, _GUARD), :] = zg                             # aligned guard
    xh_pad[pl.ds(_GUARD, M + 2 * W), :] = xh_all.astype(sdt)     # aligned store
    xh_pad[pl.ds(_GUARD + M + 2 * W, _GUARD), :] = zg            # aligned guard

    # 3x3 depthwise conv (padding=1) as 9 statically shifted reads from the
    # scratch; column wrap handled by two hoisted (M, 1) multiplicative masks.
    col = lax.broadcasted_iota(jnp.int32, (M, 1), 0)
    col = (col & (W - 1)) if (W & (W - 1)) == 0 else (col % W)
    lmask = (col != 0).astype(jnp.float32)           # used for dx == -1
    rmask = (col != W - 1).astype(jnp.float32)       # used for dx == +1

    dww = dww_ref[...]                               # (9, HF) f32
    acc = jnp.broadcast_to(dwb_ref[...], (M, HF)).astype(jnp.float32)
    for dy in (-1, 0, 1):
        for dx in (-1, 0, 1):
            start = P + dy * W + dx                  # static slice start
            sh = xh_pad[pl.ds(start, M), :].astype(jnp.float32)
            if dx == -1:
                sh = sh * lmask
            elif dx == 1:
                sh = sh * rmask
            k = (dy + 1) * 3 + (dx + 1)
            acc = acc + sh * dww[k:k + 1, :]

    # fc1 "gate" half (interior only), GELU gate, then fc2 + 1x1-skip as two
    # accumulating MXU dots (no lane concat / (M, HF+Cin) copy).
    v = jnp.dot(xm, w1g_ref[...], preferred_element_type=jnp.float32) + b1g_ref[...]
    g = (_gelu(acc, use_tanh_gelu) * v).astype(xm.dtype)          # bf16 for the MXU
    y = jnp.dot(g, w2t_ref[...], preferred_element_type=jnp.float32)
    y = y + jnp.dot(xm, wskt_ref[...], preferred_element_type=jnp.float32)
    y = y + bf_ref[...]
    # TODO(synk): nn.Dropout is identity at drop=0.0; nonzero drop rates are not implemented.
    o_ref[0] = y.astype(o_ref.dtype)


def _tpu_caps():
    """(vmem_limit_bytes, bf16_scratch, prefer_multi_step) per TPU generation."""
    kind = ""
    try:
        kind = (getattr(jax.devices()[0], "device_kind", "") or "").lower()
    except Exception:
        pass
    if "v7" in kind:
        return 52 * 2**20, True, True     # 64 MiB total: leave compiler headroom; 2 TCs
    if "v6" in kind:
        return 100 * 2**20, True, False   # 128 MiB VMEM, bf16 VPU
    if "v5" in kind or "v4" in kind:
        return 100 * 2**20, False, False  # 128 MiB VMEM, no bf16 VPU -> f32 scratch
    return 48 * 2**20, False, False       # unknown: conservative


def _tile_vmem_bytes(R, W, Cin, HF, Cout_pad, scr_bytes, wgt_bytes):
    """Rough per-step VMEM estimate (double-buffered blocks + intermediates)."""
    M = R * W
    x_blocks = 2 * (M * Cin * 2) + 2 * (2 * W * Cin * 2)     # bf16, x2 buffers
    out_blocks = 2 * (M * Cout_pad * 2)                      # bf16, x2 buffers
    scratch = (M + 2 * W + 2 * _GUARD) * HF * scr_bytes
    interm = ((M + 2 * W) * Cin * 2                          # stacked fc1 operand
              + (M + 2 * W) * HF * 4                         # xh_all f32
              + 5 * M * HF * 4                               # acc / tap / v / gelu / g
              + 2 * M * Cout_pad * 4)                        # y partials f32
    return x_blocks + out_blocks + scratch + interm + wgt_bytes


def _choose_row_tile(H, W, Cin, HF, Cout_pad, scr_bytes, wgt_bytes, budget,
                     prefer_multi_step, batch):
    divisors = [d for d in range(1, H + 1) if H % d == 0]
    fits = [d for d in divisors
            if _tile_vmem_bytes(d, W, Cin, HF, Cout_pad, scr_bytes, wgt_bytes) <= budget]
    best = max(fits) if fits else 1                   # R=1 even if over budget
    if prefer_multi_step and batch * (H // best) < 2:
        # v7x: keep >= 2 grid steps so both TensorCores get work.
        cands = [d for d in divisors if H // d >= 2]
        cfits = [d for d in cands
                 if _tile_vmem_bytes(d, W, Cin, HF, Cout_pad, scr_bytes, wgt_bytes) <= budget]
        if cfits:
            best = max(cfits)
        elif cands:
            best = max(cands)
    return best


def msmu_pallas(x, params, row_tile=None, use_tanh_gelu=False):
    """x: (B, T, H, W, C) float32.  Returns (B, H, W, Cout) float32."""
    B, T, H, W, C = x.shape
    Cin = T * C
    N = H * W
    # TODO(synk): row-tiled BlockSpecs need W % 8 == 0 (sublane tiling); other
    # widths would need a padded-token layout in the wrapper.
    assert W % 8 == 0, "msmu_pallas requires W to be a multiple of 8"

    w1, b1 = params["fc1_w"], params["fc1_b"]        # (2HF, Cin), (2HF,)
    dw_w, dw_b = params["dw_w"], params["dw_b"]      # (HF, 1, 3, 3), (HF,)
    w2, b2 = params["fc2_w"], params["fc2_b"]        # (Cout, HF), (Cout,)
    wsk, bsk = params["skip_w"], params["skip_b"]    # (Cout, Cin, 1, 1), (Cout,)
    HF = dw_w.shape[0]
    Cout = w2.shape[0]
    Cout_pad = ((Cout + 127) // 128) * 128           # lane-dense output slab

    vmem_limit, bf16_scratch, prefer_multi_step = _tpu_caps()
    scr_dtype = jnp.bfloat16 if bf16_scratch else jnp.float32
    scr_bytes = 2 if bf16_scratch else 4
    # Constant-index weight/bias blocks (double-buffered by default).
    wgt_bytes = 2 * (2 * Cin * HF * 2                # w1c, w1g (bf16)
                     + 12 * HF * 4                   # b1c, b1g, dww(9), dwb (f32)
                     + HF * Cout_pad * 2             # w2t (bf16)
                     + Cin * Cout_pad * 2            # wskt (bf16)
                     + Cout_pad * 4)                 # bf (f32)
    budget = int(0.7 * vmem_limit)

    if row_tile is None:
        R = _choose_row_tile(H, W, Cin, HF, Cout_pad, scr_bytes, wgt_bytes,
                             budget, prefer_multi_step, B)
    else:
        R = row_tile
    assert H % R == 0, "row_tile must divide H"
    nR = H // R
    M = R * W

    # 'b t h w c -> b h w (t c)' -> (B, N, Cin); bf16 MXU operands (f32 accum).
    # NOTE: this also quantizes the fc1 / 1x1-skip inputs to bf16 (deliberate).
    x_flat = jnp.transpose(x, (0, 2, 3, 1, 4)).reshape(B, N, Cin).astype(jnp.bfloat16)

    # Parameter re-layout (plain JAX glue, once per call).
    w1c = w1[:HF, :].T.astype(jnp.bfloat16)          # (Cin, HF) content half
    w1g = w1[HF:, :].T.astype(jnp.bfloat16)          # (Cin, HF) gate half
    b1c = b1[None, :HF].astype(jnp.float32)
    b1g = b1[None, HF:].astype(jnp.float32)
    dw9 = dw_w.reshape(HF, 9).T.astype(jnp.float32)  # (9, HF), k = ky*3 + kx
    dwbr = dw_b[None, :].astype(jnp.float32)
    # fc2 / 1x1-skip weight halves kept separate (two accumulating dots in-kernel),
    # zero-padded to a lane-dense Cout_pad.
    w2t = jnp.pad(w2.T, ((0, 0), (0, Cout_pad - Cout))).astype(jnp.bfloat16)
    wskt = jnp.pad(wsk.reshape(Cout, Cin).T,
                   ((0, 0), (0, Cout_pad - Cout))).astype(jnp.bfloat16)
    bfv = jnp.pad((b2 + bsk)[None, :], ((0, 0), (0, Cout_pad - Cout))).astype(jnp.float32)

    def const_spec(shape):
        return pl.BlockSpec(shape, lambda b, r: (0,) * len(shape))

    kernel = functools.partial(_msmu_kernel, W, R, use_tanh_gelu)

    out = pl.pallas_call(
        kernel,
        out_shape=jax.ShapeDtypeStruct((B, N, Cout_pad), jnp.bfloat16),
        grid=(B, nR),
        in_specs=[
            # interior tokens of the row tile
            pl.BlockSpec((1, M, Cin), lambda b, r: (b, r, 0)),
            # one-image-row halo above / below (block size = W tokens = 1 row),
            # clamped at the image boundary and zeroed in-kernel there
            pl.BlockSpec((1, W, Cin), lambda b, r: (b, jnp.maximum(r * R - 1, 0), 0)),
            pl.BlockSpec((1, W, Cin), lambda b, r: (b, jnp.minimum((r + 1) * R, H - 1), 0)),
            const_spec((Cin, HF)),
            const_spec((Cin, HF)),
            const_spec((1, HF)),
            const_spec((1, HF)),
            const_spec((9, HF)),
            const_spec((1, HF)),
            const_spec((HF, Cout_pad)),
            const_spec((Cin, Cout_pad)),
            const_spec((1, Cout_pad)),
        ],
        out_specs=pl.BlockSpec((1, M, Cout_pad), lambda b, r: (b, r, 0)),
        scratch_shapes=[pltpu.VMEM((M + 2 * W + 2 * _GUARD, HF), scr_dtype)],
        compiler_params=pltpu.CompilerParams(
            dimension_semantics=("parallel", "parallel"),
            vmem_limit_bytes=int(vmem_limit)),
    )(x_flat, x_flat, x_flat, w1c, w1g, b1c, b1g, dw9, dwbr, w2t, wskt, bfv)

    # Slice off the lane padding and cast back to f32 outside the kernel.
    return out[:, :, :Cout].astype(jnp.float32).reshape(B, H, W, Cout)


def msmu_ref(x, params):
    """Pure-JAX (f32) reference mirroring the PyTorch module exactly."""
    B, T, H, W, C = x.shape
    Cin = T * C
    HF = params["dw_w"].shape[0]
    Cout = params["fc2_w"].shape[0]

    xc = jnp.transpose(x, (0, 2, 3, 1, 4)).reshape(B, H, W, Cin)
    xf = xc.reshape(B, H * W, Cin)

    h = xf @ params["fc1_w"].T + params["fc1_b"]
    xh, v = h[..., :HF], h[..., HF:]

    xi = jnp.transpose(xh, (0, 2, 1)).reshape(B, HF, H, W)
    d = lax.conv_general_dilated(
        xi, params["dw_w"], window_strides=(1, 1), padding=((1, 1), (1, 1)),
        feature_group_count=HF,
        dimension_numbers=("NCHW", "OIHW", "NCHW"),
    ) + params["dw_b"][None, :, None, None]
    d = d.reshape(B, HF, H * W).transpose(0, 2, 1)

    g = 0.5 * d * (1.0 + lax.erf(d / jnp.sqrt(2.0))) * v
    y = g @ params["fc2_w"].T + params["fc2_b"]
    s = xf @ params["skip_w"].reshape(Cout, Cin).T + params["skip_b"]
    return (y + s).reshape(B, H, W, Cout)


if __name__ == "__main__":
    # Small, MSMU-consistent shapes: num_tl=2, in_features=24 ->
    # hidden_features = int(2*24/3) = 16, out_features = 24 // 2 = 12.
    B, T, H, W, C = 2, 2, 8, 8, 24
    num_tl, in_features = T, C
    out_features = in_features // 2
    HF = int(2 * in_features / 3)
    Cin = num_tl * in_features

    key = jax.random.PRNGKey(0)
    ks = jax.random.split(key, 9)
    x = jax.random.normal(ks[0], (B, T, H, W, C), jnp.float32)
    params = {
        "fc1_w": 0.1 * jax.random.normal(ks[1], (2 * HF, Cin), jnp.float32),
        "fc1_b": 0.5 * jax.random.normal(ks[2], (2 * HF,), jnp.float32),
        "dw_w": 0.2 * jax.random.normal(ks[3], (HF, 1, 3, 3), jnp.float32),
        "dw_b": 0.5 * jax.random.normal(ks[4], (HF,), jnp.float32),
        "fc2_w": 0.1 * jax.random.normal(ks[5], (out_features, HF), jnp.float32),
        "fc2_b": 0.5 * jax.random.normal(ks[6], (out_features,), jnp.float32),
        "skip_w": 0.1 * jax.random.normal(ks[7], (out_features, Cin, 1, 1), jnp.float32),
        "skip_b": 0.5 * jax.random.normal(ks[8], (out_features,), jnp.float32),
    }

    ref = msmu_ref(x, params)

    # Auto (budget-driven) tile size.
    out_a = jax.block_until_ready(msmu_pallas(x, params))
    assert out_a.shape == (B, H, W, out_features), out_a.shape
    # Explicit smaller row tile to exercise the halo / multi-tile path.
    out_b = jax.block_until_ready(msmu_pallas(x, params, row_tile=4))

    # Tolerance accounts for bf16 MXU operands, bf16 scratch (v6e/v7x) and the
    # bf16 output slab (f32 accumulation throughout).
    np.testing.assert_allclose(np.asarray(out_a), np.asarray(ref), rtol=3e-2, atol=3e-2)
    np.testing.assert_allclose(np.asarray(out_b), np.asarray(ref), rtol=3e-2, atol=3e-2)

    print("KERNEL_OK")
</pallas_src>

<mosaic_0001>
module attributes {stable_mosaic.version = 11 : i64} {
  func.func @_msmu_kernel(%arg0: i32, %arg1: i32, %arg2: memref<1x64x48xbf16, #tpu.memory_space<vmem>>, %arg3: memref<1x8x48xbf16, #tpu.memory_space<vmem>>, %arg4: memref<1x8x48xbf16, #tpu.memory_space<vmem>>, %arg5: memref<48x16xbf16, #tpu.memory_space<vmem>>, %arg6: memref<48x16xbf16, #tpu.memory_space<vmem>>, %arg7: memref<1x16xf32, #tpu.memory_space<vmem>>, %arg8: memref<1x16xf32, #tpu.memory_space<vmem>>, %arg9: memref<9x16xf32, #tpu.memory_space<vmem>>, %arg10: memref<1x16xf32, #tpu.memory_space<vmem>>, %arg11: memref<16x128xbf16, #tpu.memory_space<vmem>>, %arg12: memref<48x128xbf16, #tpu.memory_space<vmem>>, %arg13: memref<1x128xf32, #tpu.memory_space<vmem>>, %arg14: memref<1x64x128xbf16, #tpu.memory_space<vmem>>, %arg15: memref<112x16xf32, #tpu.memory_space<vmem>>) attributes {dimension_semantics = [#tpu.dimension_semantics<parallel>, #tpu.dimension_semantics<parallel>], iteration_bounds = array<i64: 2, 1>, scalar_prefetch = 0 : i64, scratch_operands = 1 : i64, tpu.core_type = #tpu.core_type<tc>, window_params = [{transform_indices = @transform_0, window_bounds = array<i64: 1, 64, 48>}, {transform_indices = @transform_1, window_bounds = array<i64: 1, 8, 48>}, {transform_indices = @transform_2, window_bounds = array<i64: 1, 8, 48>}, {pipeline_mode = #tpu.pipeline_mode<synchronous>, transform_indices = @transform_3, window_bounds = array<i64: 48, 16>}, {pipeline_mode = #tpu.pipeline_mode<synchronous>, transform_indices = @transform_4, window_bounds = array<i64: 48, 16>}, {pipeline_mode = #tpu.pipeline_mode<synchronous>, transform_indices = @transform_5, window_bounds = array<i64: 1, 16>}, {pipeline_mode = #tpu.pipeline_mode<synchronous>, transform_indices = @transform_6, window_bounds = array<i64: 1, 16>}, {pipeline_mode = #tpu.pipeline_mode<synchronous>, transform_indices = @transform_7, window_bounds = array<i64: 9, 16>}, {pipeline_mode = #tpu.pipeline_mode<synchronous>, transform_indices = @transform_8, window_bounds = array<i64: 1, 16>}, {pipeline_mode = #tpu.pipeline_mode<synchronous>, transform_indices = @transform_9, window_bounds = array<i64: 16, 128>}, {pipeline_mode = #tpu.pipeline_mode<synchronous>, transform_indices = @transform_10, window_bounds = array<i64: 48, 128>}, {pipeline_mode = #tpu.pipeline_mode<synchronous>, transform_indices = @transform_11, window_bounds = array<i64: 1, 128>}, {transform_indices = @transform_12, window_bounds = array<i64: 1, 64, 128>}]} {
    %c0 = arith.constant 0 : index
    %c0_0 = arith.constant 0 : index
    %c0_1 = arith.constant 0 : index
    %0 = vector.load %arg2[%c0, %c0_0, %c0_1] : memref<1x64x48xbf16, #tpu.memory_space<vmem>>, vector<1x64x48xbf16>
    %1 = vector.shape_cast %0 : vector<1x64x48xbf16> to vector<64x48xbf16>
    %c0_2 = arith.constant 0 : index
    %c0_3 = arith.constant 0 : index
    %2 = vector.load %arg5[%c0_2, %c0_3] : memref<48x16xbf16, #tpu.memory_space<vmem>>, vector<48x16xbf16>
    %c0_4 = arith.constant 0 : index
    %c0_5 = arith.constant 0 : index
    %3 = vector.load %arg7[%c0_4, %c0_5] : memref<1x16xf32, #tpu.memory_space<vmem>>, vector<1x16xf32>
    %c0_6 = arith.constant 0 : index
    %c0_7 = arith.constant 0 : index
    %c0_8 = arith.constant 0 : index
    %4 = vector.load %arg3[%c0_6, %c0_7, %c0_8] : memref<1x8x48xbf16, #tpu.memory_space<vmem>>, vector<1x8x48xbf16>
    %5 = vector.shape_cast %4 : vector<1x8x48xbf16> to vector<8x48xbf16>
    %c0_9 = arith.constant 0 : index
    %c0_10 = arith.constant 0 : index
    %c0_11 = arith.constant 0 : index
    %6 = vector.load %arg4[%c0_9, %c0_10, %c0_11] : memref<1x8x48xbf16, #tpu.memory_space<vmem>>, vector<1x8x48xbf16>
    %7 = vector.shape_cast %6 : vector<1x8x48xbf16> to vector<8x48xbf16>
    %8 = tpu.concatenate %5, %1, %7 in 0 : vector<8x48xbf16>, vector<64x48xbf16>, vector<8x48xbf16> -> vector<80x48xbf16>
    %cst = arith.constant dense<0.000000e+00> : vector<80x16xf32>
    %9 = tpu.matmul %8, %2, %cst {dimension_numbers = #tpu.dot_dimension_numbers<[1], [0], [0], [1], [0, 0, 1, 1], [], []>} : vector<80x48xbf16>, vector<48x16xbf16>, vector<80x16xf32> -> vector<80x16xf32>
    %10 = vector.broadcast %3 : vector<1x16xf32> to vector<80x16xf32>
    %11 = arith.addf %9, %10 : vector<80x16xf32>
    %12 = tpu.iota {dimensions = array<i32: 0>} : vector<80x1xi32>
    %c8_i32 = arith.constant 8 : i32
    %13 = vector.broadcast %c8_i32 : i32 to vector<80x1xi32>
    %14 = arith.cmpi sge, %12, %13 : vector<80x1xi32>
    %c0_i32 = arith.constant 0 : i32
    %15 = arith.cmpi sgt, %arg1, %c0_i32 : i32
    %16 = vector.broadcast %15 : i1 to vector<80x1xi1>
    %17 = arith.ori %14, %16 : vector<80x1xi1>
    %c72_i32 = arith.constant 72 : i32
    %18 = vector.broadcast %c72_i32 : i32 to vector<80x1xi32>
    %19 = arith.cmpi slt, %12, %18 : vector<80x1xi32>
    %c0_i32_12 = arith.constant 0 : i32
    %20 = arith.cmpi slt, %arg1, %c0_i32_12 : i32
    %21 = vector.broadcast %20 : i1 to vector<80x1xi1>
    %22 = arith.ori %19, %21 : vector<80x1xi1>
    %23 = arith.andi %17, %22 : vector<80x1xi1>
    %cst_13 = arith.constant 0.000000e+00 : f32
    %24 = vector.shape_cast %23 : vector<80x1xi1> to vector<80x1xi1>
    %25 = vector.broadcast %24 : vector<80x1xi1> to vector<80x16xi1>
    %26 = vector.broadcast %cst_13 : f32 to vector<80x16xf32>
    %27 = arith.select %25, %11, %26 : vector<80x16xi1>, vector<80x16xf32>
    %cst_14 = arith.constant 0.000000e+00 : f32
    %28 = vector.broadcast %cst_14 : f32 to vector<16x16xf32>
    %c0_15 = arith.constant 0 : index
    %c0_16 = arith.constant 0 : index
    %29 = vector.load %arg15[%c0_15, %c0_16] : memref<112x16xf32, #tpu.memory_space<vmem>>, vector<16x16xf32>
    tpu.vector_store %arg15[%c0_15, %c0_16], %28 {strides = array<i32>} : memref<112x16xf32, #tpu.memory_space<vmem>>, vector<16x16xf32>,
    %c16 = arith.constant 16 : index
    %c0_17 = arith.constant 0 : index
    %30 = vector.load %arg15[%c16, %c0_17] : memref<112x16xf32, #tpu.memory_space<vmem>>, vector<80x16xf32>
    tpu.vector_store %arg15[%c16, %c0_17], %27 {strides = array<i32>} : memref<112x16xf32, #tpu.memory_space<vmem>>, vector<80x16xf32>,
    %c96 = arith.constant 96 : index
    %c0_18 = arith.constant 0 : index
    %31 = vector.load %arg15[%c96, %c0_18] : memref<112x16xf32, #tpu.memory_space<vmem>>, vector<16x16xf32>
    tpu.vector_store %arg15[%c96, %c0_18], %28 {strides = array<i32>} : memref<112x16xf32, #tpu.memory_space<vmem>>, vector<16x16xf32>,
    %32 = tpu.iota {dimensions = array<i32: 0>} : vector<64x1xi32>
    %c7_i32 = arith.constant 7 : i32
    %33 = vector.broadcast %c7_i32 : i32 to vector<64x1xi32>
    %34 = arith.andi %32, %33 : vector<64x1xi32>
    %c0_i32_19 = arith.constant 0 : i32
    %35 = vector.broadcast %c0_i32_19 : i32 to vector<64x1xi32>
    %36 = arith.cmpi ne, %34, %35 : vector<64x1xi32>
    %37 = arith.extui %36 : vector<64x1xi1> to vector<64x1xi32>
    %38 = arith.sitofp %37 : vector<64x1xi32> to vector<64x1xf32>
    %c7_i32_20 = arith.constant 7 : i32
    %39 = vector.broadcast %c7_i32_20 : i32 to vector<64x1xi32>
    %40 = arith.cmpi ne, %34, %39 : vector<64x1xi32>
    %41 = arith.extui %40 : vector<64x1xi1> to vector<64x1xi32>
    %42 = arith.sitofp %41 : vector<64x1xi32> to vector<64x1xf32>
    %c0_21 = arith.constant 0 : index
    %c0_22 = arith.constant 0 : index
    %43 = vector.load %arg9[%c0_21, %c0_22] : memref<9x16xf32, #tpu.memory_space<vmem>>, vector<9x16xf32>
    %c0_23 = arith.constant 0 : index
    %c0_24 = arith.constant 0 : index
    %44 = vector.load %arg10[%c0_23, %c0_24] : memref<1x16xf32, #tpu.memory_space<vmem>>, vector<1x16xf32>
    %45 = vector.shape_cast %44 : vector<1x16xf32> to vector<1x16xf32>
    %46 = vector.broadcast %45 : vector<1x16xf32> to vector<64x16xf32>
    %c15 = arith.constant 15 : index
    %c0_25 = arith.constant 0 : index
    %47 = vector.load %arg15[%c15, %c0_25] : memref<112x16xf32, #tpu.memory_space<vmem>>, vector<64x16xf32>
    %48 = vector.broadcast %38 : vector<64x1xf32> to vector<64x16xf32>
    %49 = arith.mulf %47, %48 : vector<64x16xf32>
    %50 = vector.extract_strided_slice %43 {offsets = [0, 0], sizes = [1, 16], strides = [1, 1]} : vector<9x16xf32> to vector<1x16xf32>
    %51 = vector.broadcast %50 : vector<1x16xf32> to vector<64x16xf32>
    %52 = arith.mulf %49, %51 : vector<64x16xf32>
    %53 = arith.addf %46, %52 : vector<64x16xf32>
    %c16_26 = arith.constant 16 : index
    %c0_27 = arith.constant 0 : index
    %54 = vector.load %arg15[%c16_26, %c0_27] : memref<112x16xf32, #tpu.memory_space<vmem>>, vector<64x16xf32>
    %55 = vector.extract_strided_slice %43 {offsets = [1, 0], sizes = [1, 16], strides = [1, 1]} : vector<9x16xf32> to vector<1x16xf32>
    %56 = vector.broadcast %55 : vector<1x16xf32> to vector<64x16xf32>
    %57 = arith.mulf %54, %56 : vector<64x16xf32>
    %58 = arith.addf %53, %57 : vector<64x16xf32>
    %c17 = arith.constant 17 : index
    %c0_28 = arith.constant 0 : index
    %59 = vector.load %arg15[%c17, %c0_28] : memref<112x16xf32, #tpu.memory_space<vmem>>, vector<64x16xf32>
    %60 = vector.broadcast %42 : vector<64x1xf32> to vector<64x16xf32>
    %61 = arith.mulf %59, %60 : vector<64x16xf32>
    %62 = vector.extract_strided_slice %43 {offsets = [2, 0], sizes = [1, 16], strides = [1, 1]} : vector<9x16xf32> to vector<1x16xf32>
    %63 = vector.broadcast %62 : vector<1x16xf32> to vector<64x16xf32>
    %64 = arith.mulf %61, %63 : vector<64x16xf32>
    %65 = arith.addf %58, %64 : vector<64x16xf32>
    %c23 = arith.constant 23 : index
    %c0_29 = arith.constant 0 : index
    %66 = vector.load %arg15[%c23, %c0_29] : memref<112x16xf32, #tpu.memory_space<vmem>>, vector<64x16xf32>
    %67 = vector.broadcast %38 : vector<64x1xf32> to vector<64x16xf32>
    %68 = arith.mulf %66, %67 : vector<64x16xf32>
    %69 = vector.extract_strided_slice %43 {offsets = [3, 0], sizes = [1, 16], strides = [1, 1]} : vector<9x16xf32> to vector<1x16xf32>
    %70 = vector.broadcast %69 : vector<1x16xf32> to vector<64x16xf32>
    %71 = arith.mulf %68, %70 : vector<64x16xf32>
    %72 = arith.addf %65, %71 : vector<64x16xf32>
    %c24 = arith.constant 24 : index
    %c0_30 = arith.constant 0 : index
    %73 = vector.load %arg15[%c24, %c0_30] : memref<112x16xf32, #tpu.memory_space<vmem>>, vector<64x16xf32>
    %74 = vector.extract_strided_slice %43 {offsets = [4, 0], sizes = [1, 16], strides = [1, 1]} : vector<9x16xf32> to vector<1x16xf32>
    %75 = vector.broadcast %74 : vector<1x16xf32> to vector<64x16xf32>
    %76 = arith.mulf %73, %75 : vector<64x16xf32>
    %77 = arith.addf %72, %76 : vector<64x16xf32>
    %c25 = arith.constant 25 : index
    %c0_31 = arith.constant 0 : index
    %78 = vector.load %arg15[%c25, %c0_31] : memref<112x16xf32, #tpu.memory_space<vmem>>, vector<64x16xf32>
    %79 = vector.broadcast %42 : vector<64x1xf32> to vector<64x16xf32>
    %80 = arith.mulf %78, %79 : vector<64x16xf32>
    %81 = vector.extract_strided_slice %43 {offsets = [5, 0], sizes = [1, 16], strides = [1, 1]} : vector<9x16xf32> to vector<1x16xf32>
    %82 = vector.broadcast %81 : vector<1x16xf32> to vector<64x16xf32>
    %83 = arith.mulf %80, %82 : vector<64x16xf32>
    %84 = arith.addf %77, %83 : vector<64x16xf32>
    %c31 = arith.constant 31 : index
    %c0_32 = arith.constant 0 : index
    %85 = vector.load %arg15[%c31, %c0_32] : memref<112x16xf32, #tpu.memory_space<vmem>>, vector<64x16xf32>
    %86 = vector.broadcast %38 : vector<64x1xf32> to vector<64x16xf32>
    %87 = arith.mulf %85, %86 : vector<64x16xf32>
    %88 = vector.extract_strided_slice %43 {offsets = [6, 0], sizes = [1, 16], strides = [1, 1]} : vector<9x16xf32> to vector<1x16xf32>
    %89 = vector.broadcast %88 : vector<1x16xf32> to vector<64x16xf32>
    %90 = arith.mulf %87, %89 : vector<64x16xf32>
    %91 = arith.addf %84, %90 : vector<64x16xf32>
    %c32 = arith.constant 32 : index
    %c0_33 = arith.constant 0 : index
    %92 = vector.load %arg15[%c32, %c0_33] : memref<112x16xf32, #tpu.memory_space<vmem>>, vector<64x16xf32>
    %93 = vector.extract_strided_slice %43 {offsets = [7, 0], sizes = [1, 16], strides = [1, 1]} : vector<9x16xf32> to vector<1x16xf32>
    %94 = vector.broadcast %93 : vector<1x16xf32> to vector<64x16xf32>
    %95 = arith.mulf %92, %94 : vector<64x16xf32>
    %96 = arith.addf %91, %95 : vector<64x16xf32>
    %c33 = arith.constant 33 : index
    %c0_34 = arith.constant 0 : index
    %97 = vector.load %arg15[%c33, %c0_34] : memref<112x16xf32, #tpu.memory_space<vmem>>, vector<64x16xf32>
    %98 = vector.broadcast %42 : vector<64x1xf32> to vector<64x16xf32>
    %99 = arith.mulf %97, %98 : vector<64x16xf32>
    %100 = vector.extract_strided_slice %43 {offsets = [8, 0], sizes = [1, 16], strides = [1, 1]} : vector<9x16xf32> to vector<1x16xf32>
    %101 = vector.broadcast %100 : vector<1x16xf32> to vector<64x16xf32>
    %102 = arith.mulf %99, %101 : vector<64x16xf32>
    %103 = arith.addf %96, %102 : vector<64x16xf32>
    %c0_35 = arith.constant 0 : index
    %c0_36 = arith.constant 0 : index
    %104 = vector.load %arg6[%c0_35, %c0_36] : memref<48x16xbf16, #tpu.memory_space<vmem>>, vector<48x16xbf16>
    %cst_37 = arith.constant dense<0.000000e+00> : vector<64x16xf32>
    %105 = tpu.matmul %1, %104, %cst_37 {dimension_numbers = #tpu.dot_dimension_numbers<[1], [0], [0], [1], [0, 0, 1, 1], [], []>} : vector<64x48xbf16>, vector<48x16xbf16>, vector<64x16xf32> -> vector<64x16xf32>
    %c0_38 = arith.constant 0 : index
    %c0_39 = arith.constant 0 : index
    %106 = vector.load %arg8[%c0_38, %c0_39] : memref<1x16xf32, #tpu.memory_space<vmem>>, vector<1x16xf32>
    %107 = vector.broadcast %106 : vector<1x16xf32> to vector<64x16xf32>
    %108 = arith.addf %105, %107 : vector<64x16xf32>
    %cst_40 = arith.constant 5.000000e-01 : f32
    %109 = vector.broadcast %cst_40 : f32 to vector<64x16xf32>
    %110 = arith.mulf %109, %103 : vector<64x16xf32>
    %cst_41 = arith.constant 0.707106769 : f32
    %111 = vector.broadcast %cst_41 : f32 to vector<64x16xf32>
    %112 = arith.mulf %103, %111 : vector<64x16xf32>
    %113 = math.erf %112 : vector<64x16xf32>
    %cst_42 = arith.constant 1.000000e+00 : f32
    %114 = vector.broadcast %cst_42 : f32 to vector<64x16xf32>
    %115 = arith.addf %114, %113 : vector<64x16xf32>
    %116 = arith.mulf %110, %115 : vector<64x16xf32>
    %117 = arith.mulf %116, %108 : vector<64x16xf32>
    %118 = arith.truncf %117 : vector<64x16xf32> to vector<64x16xbf16>
    %c0_43 = arith.constant 0 : index
    %c0_44 = arith.constant 0 : index
    %119 = vector.load %arg11[%c0_43, %c0_44] : memref<16x128xbf16, #tpu.memory_space<vmem>>, vector<16x128xbf16>
    %cst_45 = arith.constant dense<0.000000e+00> : vector<64x128xf32>
    %120 = tpu.matmul %118, %119, %cst_45 {dimension_numbers = #tpu.dot_dimension_numbers<[1], [0], [0], [1], [0, 0, 1, 1], [], []>} : vector<64x16xbf16>, vector<16x128xbf16>, vector<64x128xf32> -> vector<64x128xf32>
    %c0_46 = arith.constant 0 : index
    %c0_47 = arith.constant 0 : index
    %121 = vector.load %arg12[%c0_46, %c0_47] : memref<48x128xbf16, #tpu.memory_space<vmem>>, vector<48x128xbf16>
    %cst_48 = arith.constant dense<0.000000e+00> : vector<64x128xf32>
    %122 = tpu.matmul %1, %121, %cst_48 {dimension_numbers = #tpu.dot_dimension_numbers<[1], [0], [0], [1], [0, 0, 1, 1], [], []>} : vector<64x48xbf16>, vector<48x128xbf16>, vector<64x128xf32> -> vector<64x128xf32>
    %123 = arith.addf %120, %122 : vector<64x128xf32>
    %c0_49 = arith.constant 0 : index
    %c0_50 = arith.constant 0 : index
    %124 = vector.load %arg13[%c0_49, %c0_50] : memref<1x128xf32, #tpu.memory_space<vmem>>, vector<1x128xf32>
    %125 = vector.broadcast %124 : vector<1x128xf32> to vector<64x128xf32>
    %126 = arith.addf %123, %125 : vector<64x128xf32>
    %127 = arith.truncf %126 : vector<64x128xf32> to vector<64x128xbf16>
    %c0_51 = arith.constant 0 : index
    %c0_52 = arith.constant 0 : index
    %c0_53 = arith.constant 0 : index
    %128 = vector.load %arg14[%c0_51, %c0_52, %c0_53] : memref<1x64x128xbf16, #tpu.memory_space<vmem>>, vector<1x64x128xbf16>
    %129 = vector.shape_cast %128 : vector<1x64x128xbf16> to vector<64x128xbf16>
    %130 = vector.shape_cast %127 : vector<64x128xbf16> to vector<1x64x128xbf16>
    tpu.vector_store %arg14[%c0_51, %c0_52, %c0_53], %130 {strides = array<i32>} : memref<1x64x128xbf16, #tpu.memory_space<vmem>>, vector<1x64x128xbf16>,
    return
  }
  func.func @transform_0(%arg0: i32, %arg1: i32) -> (i32, i32, i32) {
    %c0_i32 = arith.constant 0 : i32
    %c0_i32_0 = arith.constant 0 : i32
    return %arg0, %arg1, %c0_i32 : i32, i32, i32
  }
  func.func @transform_1(%arg0: i32, %arg1: i32) -> (i32, i32, i32) {
    %c8_i32 = arith.constant 8 : i32
    %0 = arith.muli %arg1, %c8_i32 : i32
    %c1_i32 = arith.constant 1 : i32
    %1 = arith.subi %0, %c1_i32 : i32
    %c0_i32 = arith.constant 0 : i32
    %2 = arith.maxsi %1, %c0_i32 : i32
    %c0_i32_0 = arith.constant 0 : i32
    %c0_i32_1 = arith.constant 0 : i32
    return %arg0, %2, %c0_i32_0 : i32, i32, i32
  }
  func.func @transform_2(%arg0: i32, %arg1: i32) -> (i32, i32, i32) {
    %c1_i32 = arith.constant 1 : i32
    %0 = arith.addi %arg1, %c1_i32 : i32
    %c8_i32 = arith.constant 8 : i32
    %1 = arith.muli %0, %c8_i32 : i32
    %c7_i32 = arith.constant 7 : i32
    %2 = arith.minsi %1, %c7_i32 : i32
    %c0_i32 = arith.constant 0 : i32
    %c0_i32_0 = arith.constant 0 : i32
    return %arg0, %2, %c0_i32 : i32, i32, i32
  }
  func.func @transform_3(%arg0: i32, %arg1: i32) -> (i32, i32) {
    %c0_i32 = arith.constant 0 : i32
    %c0_i32_0 = arith.constant 0 : i32
    %c0_i32_1 = arith.constant 0 : i32
    return %c0_i32, %c0_i32_0 : i32, i32
  }
  func.func @transform_4(%arg0: i32, %arg1: i32) -> (i32, i32) {
    %c0_i32 = arith.constant 0 : i32
    %c0_i32_0 = arith.constant 0 : i32
    %c0_i32_1 = arith.constant 0 : i32
    return %c0_i32, %c0_i32_0 : i32, i32
  }
  func.func @transform_5(%arg0: i32, %arg1: i32) -> (i32, i32) {
    %c0_i32 = arith.constant 0 : i32
    %c0_i32_0 = arith.constant 0 : i32
    %c0_i32_1 = arith.constant 0 : i32
    return %c0_i32, %c0_i32_0 : i32, i32
  }
  func.func @transform_6(%arg0: i32, %arg1: i32) -> (i32, i32) {
    %c0_i32 = arith.constant 0 : i32
    %c0_i32_0 = arith.constant 0 : i32
    %c0_i32_1 = arith.constant 0 : i32
    return %c0_i32, %c0_i32_0 : i32, i32
  }
  func.func @transform_7(%arg0: i32, %arg1: i32) -> (i32, i32) {
    %c0_i32 = arith.constant 0 : i32
    %c0_i32_0 = arith.constant 0 : i32
    %c0_i32_1 = arith.constant 0 : i32
    return %c0_i32, %c0_i32_0 : i32, i32
  }
  func.func @transform_8(%arg0: i32, %arg1: i32) -> (i32, i32) {
    %c0_i32 = arith.constant 0 : i32
    %c0_i32_0 = arith.constant 0 : i32
    %c0_i32_1 = arith.constant 0 : i32
    return %c0_i32, %c0_i32_0 : i32, i32
  }
  func.func @transform_9(%arg0: i32, %arg1: i32) -> (i32, i32) {
    %c0_i32 = arith.constant 0 : i32
    %c0_i32_0 = arith.constant 0 : i32
    %c0_i32_1 = arith.constant 0 : i32
    return %c0_i32, %c0_i32_0 : i32, i32
  }
  func.func @transform_10(%arg0: i32, %arg1: i32) -> (i32, i32) {
    %c0_i32 = arith.constant 0 : i32
    %c0_i32_0 = arith.constant 0 : i32
    %c0_i32_1 = arith.constant 0 : i32
    return %c0_i32, %c0_i32_0 : i32, i32
  }
  func.func @transform_11(%arg0: i32, %arg1: i32) -> (i32, i32) {
    %c0_i32 = arith.constant 0 : i32
    %c0_i32_0 = arith.constant 0 : i32
    %c0_i32_1 = arith.constant 0 : i32
    return %c0_i32, %c0_i32_0 : i32, i32
  }
  func.func @transform_12(%arg0: i32, %arg1: i32) -> (i32, i32, i32) {
    %c0_i32 = arith.constant 0 : i32
    %c0_i32_0 = arith.constant 0 : i32
    return %arg0, %arg1, %c0_i32 : i32, i32, i32
  }
}

</mosaic_0001>

<bundles_post_ra>
// kernel: tpu_custom_call.1
= control target key start
LH: loop header
LB: loop body
LE: loop exit
PB: predicated region body
PF: predicated region fallthrough
CT: control target
= control target key end

     0   :  { %s2817_s0 = inlined_call_operand.vmem [shape: bf16[2,64,48], index: 0, kind: input, shape index: {}]   ;;  %s2818_s1 = inlined_call_operand.vmem [shape: bf16[2,64,48], index: 1, kind: input, shape index: {}]   ;;  %s2819_s2 = inlined_call_operand.vmem [shape: bf16[2,64,48], index: 2, kind: input, shape index: {}]   ;;  %s2820_s3 = inlined_call_operand.vmem [shape: bf16[48,16], index: 3, kind: input, shape index: {}]   ;;  %s2821_s4 = inlined_call_operand.vmem [shape: bf16[48,16], index: 4, kind: input, shape index: {}]   ;;  %s2822_s5 = inlined_call_operand.vmem [shape: f32[1,16], index: 5, kind: input, shape index: {}]   ;;  %s2823_s6 = inlined_call_operand.vmem [shape: f32[1,16], index: 6, kind: input, shape index: {}]   ;;  %s2824_s7 = inlined_call_operand.vmem [shape: f32[9,16], index: 7, kind: input, shape index: {}]   ;;  %s2825_s8 = inlined_call_operand.vmem [shape: f32[1,16], index: 8, kind: input, shape index: {}]   ;;  %s2826_s9 = inlined_call_operand.vmem [shape: bf16[16,128], index: 9, kind: input, shape index: {}]   ;;  %s2827_s10 = inlined_call_operand.vmem [shape: bf16[48,128], index: 10, kind: input, shape index: {}]   ;;  %s2828_s11 = inlined_call_operand.vmem [shape: f32[1,128], index: 11, kind: input, shape index: {}]   ;;  %s2829_s12 = inlined_call_operand.hbm [shape: bf16[2,64,128], index: 12, kind: output, shape index: {}]  }
   0x1   :  { %2834 = sst [smem:[#allocation13_spill]] %s2820_s3 }
   0x2   :  { %17 = vsyncpa [#allocation4], 0 }
   0x3   :  { %19 = vsyncpa [#allocation4 + $0x1], 0  ;;  %s2146_s21 = smov 0   ;;  %s2148_s22 = smov 0  }
   0x4   :  { %s2150_s23 = smov 0   ;;  %s2152_s24 = smov 0  }
   0x5   :  { %s2154_s25 = smov 0   ;;  %s2156_s26 = smov 0  }
   0x6 LB: > { %2835 = sst [smem:[#allocation6_spill]] %s2070_s25  ;;  %s1682_s27 = sadd.s32 4294967295, %s2074_s26   ;;  %s2074_s26 = sphi %s2156_s26, %s25_s26   ;;  %s2070_s25 = sphi %s2154_s25, %s2873_s25   ;;  %s2066_s24 = sphi %s2152_s24, %s2872_s24   ;;  %s2062_s23 = sphi %s2150_s23, %s2876_s23   ;;  %s2058_s22 = sphi %s2148_s22, %s2875_s22   ;;  %s2054_s21 = sphi %s2146_s21, %s2874_s21  }
   0x7   : > { %s1683_s28 = sadd.s32 4294967294, %s2074_s26   ;;  %s37_s29 = sadd.s32 1, %s2070_s25 }
   0x8   : > { %s335_s30 = sadd.s32 1, %s2062_s23  ;;  %p39_p0 = scmp.ge.s32.totalorder %s37_s29, 2 }
   0x9   : > { %p345_p1 = scmp.ne.s32.totalorder %s2062_s23, %s2058_s22  ;;  %p346_p2 = scmp.eq.s32.totalorder %s1682_s27, 1 }
   0xa   : > { %p351_p3 = scmp.ne.s32.totalorder %s2058_s22, %s2054_s21  ;;  %s2878_s29 = smov (%p39_p0, %s37_s29), 0 }
   0xb   : > { %2836 = sst [smem:[#allocation7_spill]] %s2878_s29  ;;  %p2186_p4 = por %p346_p2, %p345_p1 }
   0xc   : > { %p352_p5 = scmp.eq.s32.totalorder %s1683_s28, 1  ;;  %s330_s14 = ssub.s32 %s2070_s25, %s2878_s29 }
   0xd   : > { %p1686_p6 = scmp.ge.s32.totalorder %s2074_s26, 1  ;;  %p333_p7 = scmp.eq.s32.totalorder %s330_s14, 0 }
   0xe   : > { %p2193_p8 = por %p352_p5, %p351_p3  ;;  %p448_p9 = scmp.lt.s32.totalorder %s2074_s26, 3 }
   0xf   : > { %s2199_s16 = scalar_select %p333_p7, %s2062_s23, %s335_s30  }
  0x10   : > { %p449_p10 = pnand %p1686_p6, %p448_p9 }
  0x12   : > { %452 = sbr.rel (%p449_p10) target bundleno = 589 (0x24d), region = 68 }
  0x19   : > { %s2839_s3 = sld [smem:[#allocation13_spill]]  ;;  %v2076_v1 = vmov 0.0   ;;  %vm2077_vm0 = vmmov 0   ;;  %p519_p11 = scmp.lt.s32.totalorder %s2066_s24, 1  ;;  %v1969_v4 = vld [vmem:[%s2821_s4] sm:$0xff]   ;;  %vm603_vm1 = vcmask 1043456   ;;  %v721_v32 = vlaneseq }
  0x1a   : > { %1829 = vmatprep.subr.bf16.mxu0 %v2076_v1  ;;  %1835 = vmatprep.mubr.msk.bf16.mxu0 %vm2077_vm0, %v2076_v1  ;;  %v1970_v5 = vld [vmem:[%s2821_s4 + $0x8] sm:$0xff]   ;;  %v1971_v6 = vld [vmem:[%s2821_s4 + $0x10] sm:$0xff]   ;;  %vm634_vm2 = vcmask 392192   ;;  %vm820_vm3 = vcmask 130048   ;;  %v1976_v28 = vld [vmem:[%s2827_s10] sm:$0xff]   ;;  %s1777_s27 = sshll.u32 %s2066_s24, 9 }
  0x1b   : > { %s520_s30 = scalar_select %p519_p11, %s2066_s24, 1  ;;  %1855 = vmatprep.subr.bf16.mxu1 %v1969_v4  ;;  %822 = vst.msk [vmem:[#allocation2 + $0x8] sm:$0xff] %vm820_vm3, %v2076_v1  ;;  %823 = vst.msk [vmem:[#allocation2 + $0x10] sm:$0xff] %vm820_vm3, %v2076_v1  ;;  %v1977_v29 = vld [vmem:[%s2827_s10 + $0x8] sm:$0xff]   ;;  %v1978_v30 = vld [vmem:[%s2827_s10 + $0x10] sm:$0xff]   ;;  %v2288_v33 = vshrl.u32 %v721_v32, 7 }
  0x1c   : > { %1856 = vmatpush3.bf16.msra.mxu1 %v1969_v4  ;;  %832 = vst.msk [vmem:[#allocation2 + $0x58] sm:$0xff] %vm820_vm3, %v2076_v1  ;;  %833 = vst.msk [vmem:[#allocation2 + $0x60] sm:$0xff] %vm820_vm3, %v2076_v1  ;;  %v1979_v31 = vld [vmem:[%s2826_s9] sm:$0xff]   ;;  %s2767_s17 = scalar_lea.hbm %s2829_s12, %s1777_s27  ;;  %s2078_s29 = smov [#allocation3]  }
  0x1d   : > { %s1765_s20 = sshll.u32 %s520_s30, 5  ;;  %1857 = vmatprep.subr.bf16.mxu1 %v1970_v5  ;;  %v835_v34 = vand.u32 7, %v2288_v33  ;;  %v918_v35 = vsub.s32 0, %v2288_v33  ;;  %v2295_v36 = vld [vmem:[%s2824_s7] sm:$0xff]  ;;  %v946_v40 = vsub.s32 1, %v2288_v33  ;;  %v723_v42 = vadd.s32 8, %v2288_v33 }
  0x1e   : > { %s539_s18 = scalar_lea.vmem %s2818_s1, %s1765_s20  ;;  %s1768_s25 = sadd.s32 28, %s1765_s20  ;;  %v724_v43 = vadd.s32 16, %v2288_v33  ;;  %v1032_v44 = vsub.s32 4, %v2288_v33  ;;  %v2311_v46 = vld [vmem:[%s2822_s5] ss:$0 sm:$0xff]  ;;  %v982_v48 = vsub.s32 2, %v2288_v33 }
  0x1f   : > { %v1960_v0 = vld [vmem:[%s2839_s3] sm:$0xff]   ;;  %v1961_v2 = vld [vmem:[%s2839_s3 + $0x8] sm:$0xff]   ;;  %v1962_v3 = vld [vmem:[%s2839_s3 + $0x10] sm:$0xff]   ;;  %s2229_s3 = scalar_lea.vmem %s2817_s0, %s1765_s20  ;;  %s555_s19 = scalar_lea.vmem %s2819_s2, %s1768_s25  ;;  %vm843_vm4 = vcmp.ne.s32.totalorder %v835_v34, 0  ;;  %v2301_v39 = vrot.slane %v2295_v36, %v918_v35  ;;  %v2314_v47 = vrot.slane %v2295_v36, %v946_v40  ;;  %v725_v53 = vadd.s32 24, %v2288_v33 }
  0x20   : > { %1830 = vmatpush3.bf16.msra.mxu0 %v1960_v0  ;;  %v562_v7 = vld [vmem:[%s2229_s3] sm:$0xf]  ;;  %v563_v9 = vld [vmem:[%s2229_s3 + $0x4] sm:$0xf]  ;;  %1858 = vmatpush3.bf16.msra.mxu1 %v1970_v5  ;;  %v564_v13 = vld [vmem:[%s2229_s3 + $0x8] sm:$0xf]  ;;  %v2327_v60 = vrot.slane %v2295_v36, %v1032_v44 }
  0x21   : > { %1831 = vmatprep.subr.bf16.mxu0 %v2076_v1  ;;  %v577_v8 = vld [vmem:[%s539_s18] sm:$0xf]  ;;  %v1694_v10 = vcombine.low %v562_v7, %v562_v7  ;;  %v1728_v11 = vcombine.low %v562_v7, %v563_v9  ;;  %1859 = vmatprep.subr.bf16.mxu1 %v1971_v6  ;;  %v565_v14 = vld [vmem:[%s2229_s3 + $0xc] sm:$0xf]  ;;  %v566_v15 = vld [vmem:[%s2229_s3 + $0x10] sm:$0xf]  ;;  %v1695_v19 = vcombine.low %v563_v9, %v564_v13 }
  0x22   : > { %v567_v16 = vld [vmem:[%s2229_s3 + $0x14] sm:$0xf]  ;;  %v1729_v17 = vcombine.low %v564_v13, %v565_v14  ;;  %v568_v20 = vld [vmem:[%s2229_s3 + $0x18] sm:$0xf]  ;;  %v569_v21 = vld [vmem:[%s2229_s3 + $0x1c] sm:$0xf]  ;;  %v1696_v23 = vcombine.low %v565_v14, %v566_v15 }
  0x23   : > { %v606_v12 = vsel %vm603_vm1, %v577_v8, %v1694_v10  ;;  %1861 = vmatprep.mubr.msk.bf16.mxu1 %vm634_vm2, %v1728_v11  ;;  %v1730_v18 = vcombine.low %v566_v15, %v567_v16  ;;  %v1731_v22 = vcombine.low %v568_v20, %v569_v21  ;;  %v1697_v24 = vcombine.low %v567_v16, %v568_v20  ;;  %v1968_v26 = vld [vmem:[%s555_s19] ss:$0 sps:$4 sm:$0xff]   ;;  %v900_v38 = vld [vmem:[#allocation2 + $0xf] sm:$0xff]  ;;  %s515_s25 = sand.u32 1, %s2058_s22   ;;  %s2000_s30 = sshll.u32 %s2078_s29, 4  ;;  %s2001_s30 = int_to_ptr.vmem [resolvable:$false] %s2000_s30 }
  0x24   : > { %1832 = vmatpush3.bf16.msra.mxu0 %v1961_v2  ;;  %1860 = vmatpush3.bf16.msra.mxu1 %v1971_v6  ;;  %v1698_v25 = vcombine.low %v569_v21, %v569_v21  ;;  %v2298_v37 = vsel %vm843_vm4, 1.0, %v2076_v1  ;;  %v2321_v51 = vld [vmem:[%s2825_s8] ss:$0 sm:$0xff]  ;;  %v936_v52 = vld [vmem:[#allocation2 + $0x10] sm:$0xff]  ;;  %v836_v54 = vand.u32 7, %v723_v42  ;;  %v837_v56 = vand.u32 7, %v724_v43 }
  0x25   : > { %1833 = vmatprep.subr.bf16.mxu0 %v2076_v1  ;;  %1869 = vmatprep.subr.bf16.mxu1 %v1976_v28  ;;  %v908_v41 = vmul.f32 %v2298_v37, %v900_v38  ;;  %v1011_v59 = vsub.s32 3, %v2288_v33  ;;  %vm2329_vm5 = vcmp.ne.s32.totalorder %v835_v34, 7  ;;  %v948_v63 = vmul.f32 %v2314_v47, %v936_v52  ;;  %v2502_v34 = vld [vmem:[%s2824_s7 + $0x8] ss:$0 sm:$0xff]  ;;  %s1687_s19 = sshll.u32 %s515_s25, 5  ;;  %s2771_s18 = scalar_lea.sflag [#allocation4], %s515_s25 }
  0x26   : > { %v609_v27 = vsel %vm603_vm1, %v1698_v25, %v1968_v26  ;;  %v726_v0 = vadd.s32 32, %v2288_v33  ;;  %v2338_v2 = vrot.slane %v2295_v36, %v982_v48  ;;  %v838_v4 = vand.u32 7, %v725_v53  ;;  %s517_s3 = scalar_lea.vmem [#allocation3], %s1687_s19  ;;  %s2002_s19 = scalar_lea.vmem %s2001_s30, 1024 }
  0x27   : > { %1862 = vmatmul.mubr.msk.bf16.vlgmr.msra.gmra.mrb[0].mxu1 %vm634_vm2, %v1729_v17  ;;  %v920_v49 = vmul.f32 %v2301_v39, %v908_v41  ;;  %vm844_vm6 = vcmp.ne.s32.totalorder %v836_v54, 0  ;;  %v728_v5 = vadd.s32 48, %v2288_v33  ;;  %vm2343_vm7 = vcmp.ne.s32.totalorder %v837_v56, 0  ;;  %s1567_s20 = sshll.u32 %s517_s3, 4  ;;  %s2762_s20 = int_to_ptr.vmem [resolvable:$true] %s1567_s20 }
  0x28   : > { %1834 = vmatpush3.bf16.msra.mxu0 %v1962_v3  ;;  %1865 = vmatprep.mubr.msk.bf16.mxu1 %vm634_vm2, %v1730_v18  ;;  %v1061_v7 = vsub.s32 5, %v2288_v33  ;;  %v1111_v8 = vsub.s32 7, %v2288_v33  ;;  %v729_v10 = vadd.s32 56, %v2288_v33  ;;  %vm2352_vm8 = vcmp.ne.s32.totalorder %v837_v56, 7  ;;  %s1996_s24 = scalar_lea.vmem %s2762_s20, 512  ;;  %p2003_p1 = scmp.lt.s32.totalorder %s2762_s20, %s2001_s30 }
  0x29   : > { %1870 = vmatpush3.bf16.msra.mxu1 %v1976_v28  ;;  %v928_v62 = vadd.f32 %v2321_v51, %v920_v49  ;;  %v2362_v13 = vsel %vm2329_vm5, 1.0, %v2076_v1  ;;  %v727_v15 = vadd.s32 40, %v2288_v33  ;;  %v839_v21 = vand.u32 7, %v726_v0  ;;  %v1129_v49 = vld [vmem:[#allocation2 + $0x59] sm:$0xff]  ;;  %p1997_p12 = scmp.ne.s32.totalorder %s2762_s20, %s1996_s24  ;;  %p2004_p2 = scmp.lt.s32.totalorder %s2002_s19, %s1996_s24 }
  0x2a   : > { %1871 = vmatprep.subr.bf16.mxu1 %v1977_v29  ;;  %vm2379_vm9 = vcmp.ne.s32.totalorder %v838_v4, 0  ;;  %v841_v26 = vand.u32 7, %v728_v5  ;;  %v2386_v28 = vsel %vm2352_vm8, 1.0, %v2076_v1  ;;  %vm2396_vm10 = vcmp.ne.s32.totalorder %v838_v4, 7  ;;  %v1108_v5 = vld [vmem:[#allocation2 + $0x58] sm:$0xff] }
  0x2b   : > { %1836 = vmatmul.mubr.msk.bf16.vlgmr.msra.gmra.mrb[0].mxu0 %vm634_vm2, %v606_v12  ;;  %v2357_v12 = vrot.slane %v2295_v36, %v1011_v59  ;;  %vm2400_vm11 = vcmp.ne.s32.totalorder %v836_v54, 7  ;;  %v840_v38 = vand.u32 7, %v727_v15  ;;  %v2410_v43 = vsel %vm2379_vm9, 1.0, %v2076_v1  ;;  %p1998_p13 = pnand %p1997_p12, %p2186_p4  ;;  %p2005_p3 = por %p2004_p2, %p2003_p1 }
  0x2c   : > { %1839 = vmatprep.mubr.msk.bf16.mxu0 %vm2077_vm0, %v2076_v1  ;;  %vm2412_vm13 = vcmp.ne.s32.totalorder %v839_v21, 0  ;;  %vm849_vm14 = vcmp.ne.s32.totalorder %v841_v26, 0  ;;  %vm871_vm15 = vcmp.ne.s32.totalorder %v839_v21, 7  ;;  %v2429_v52 = vsel %vm2400_vm11, 1.0, %v2076_v1 }
  0x2d   : > { %1872 = vmatpush3.bf16.msra.mxu1 %v1977_v29  ;;  %v2389_v29 = vrot.slane %v2295_v36, %v1061_v7  ;;  %vm2435_vm1 = vcmp.ne.s32.totalorder %v841_v26, 7  ;;  %vm2451_vm4 = vcmp.ne.s32.totalorder %v840_v38, 7  ;;  %v2461_v0 = vsel %vm2412_vm13, 1.0, %v2076_v1  ;;  %p1999_p0 = pneg %p1998_p13 }
  0x2e   : > { %1873 = vmatprep.subr.bf16.mxu1 %v1978_v30  ;;  %v2464_v4 = vsel %vm871_vm15, 1.0, %v2076_v1 }
  0x2f   : > { %1866 = vmatmul.mubr.msk.bf16.gmra.mrb[4].mxu1 %vm634_vm2, %v1731_v22  ;;  %p2006_p5 = pnand %p2005_p3, %p1999_p0 }
  0x30   : > { %1875 = vmatprep.mubr.msk.bf16.mxu1 %vm634_vm2, %v1728_v11  ;;  %v2473_v11 = vld [vmem:[%s2823_s6] ss:$0 sm:$0xff] }
  0x31   : > { %1874 = vmatpush3.bf16.msra.mxu1 %v1978_v30  ;;  %v2392_v30 = vrot.slane %v2295_v36, %v1111_v8  ;;  %2866 = vst [vmem:[#allocation12_spill] sm:$0xff] %v2473_v11 }
  0x32   : > { %1883 = vmatprep.subr.bf16.mxu1 %v1979_v31 }
  0x33   : > { %1840 = vmatmul.mubr.msk.bf16.gmra.mrb[4].mxu0 %vm634_vm2, %v1695_v19  ;;  %v2369_v19 = vsel %vm844_vm6, 1.0, %v2076_v1 }
  0x34   : > { %1843 = vmatprep.mubr.msk.bf16.mxu0 %vm2077_vm0, %v2076_v1 }
  0x37   : > { %1876 = vmatmul.mubr.msk.bf16.vlgmr.msra.gmra.mrb[8].mxu1 %vm634_vm2, %v1729_v17  ;;  %v1090_v17 = vsub.s32 6, %v2288_v33 }
  0x38   : > { %1879 = vmatprep.mubr.msk.bf16.mxu1 %vm634_vm2, %v1730_v18  ;;  %1884 = vmatpush3.bf16.msra.mxu1 %v1979_v31  ;;  %v956_v18 = vadd.f32 %v948_v63, %v928_v62  ;;  %v842_v31 = vand.u32 7, %v729_v10  ;;  %v2456_v63 = vsel %vm849_vm14, 1.0, %v2076_v1 }
  0x39   : > { %v2405_v40 = vrot.slane %v2295_v36, %v1090_v17 }
  0x3a   : > { %vm874_vm12 = vcmp.ne.s32.totalorder %v842_v31, 7 }
  0x3b   : > { %1844 = vmatmul.mubr.msk.bf16.gmra.mrb[8].mxu0 %vm634_vm2, %v1696_v23 }
  0x3c   : > { %1847 = vmatprep.mubr.msk.bf16.mxu0 %vm2077_vm0, %v2076_v1 }
  0x3f   : > { %1880 = vmatmul.mubr.msk.bf16.gmra.mrb[12].mxu1 %vm634_vm2, %v1731_v22 }
  0x43   : > { %1848 = vmatmul.mubr.msk.bf16.gmra.mrb[12].mxu0 %vm634_vm2, %v1697_v24  ;;  %v2377_v24 = vsel %vm2343_vm7, 1.0, %v2076_v1 }
  0x44   : > { %1851 = vmatprep.mubr.msk.bf16.mxu0 %vm2077_vm0, %v2076_v1  ;;  %vm2431_vm0 = vcmp.ne.s32.totalorder %v842_v31, 0  ;;  %v2495_v31 = vsel %vm2451_vm4, 1.0, %v2076_v1 }
  0x45   : > { %v2479_v21 = vsel %vm2431_vm0, 1.0, %v2076_v1 }
  0x4b   : > { %1852 = vmatmul.mubr.msk.bf16.gmra.mrb[16].mxu0 %vm634_vm2, %v609_v27  ;;  %vm2447_vm2 = vcmp.ne.s32.totalorder %v840_v38, 0 }
  0xfa   : > { %v2340_v3 = vpop.f32.mrb[0].mxu1 }
  0xfb   : > { %v2349_v9 = vpop.f32.mrb[1].mxu1  ;;  %v2526_v59 = vadd.f32 %v2340_v3, %v2473_v11 }
  0xfc   : > { %v2364_v14 = vpop.f32.mrb[2].mxu1  ;;  %v2530_v61 = vadd.f32 %v2473_v11, %v2349_v9 }
  0xfd   : > { %v2371_v20 = vpop.f32.mrb[3].mxu1 }
  0xfe   : > { %v682_v45 = vpop.f32.mrb[0].mxu0  ;;  %v2545_v9 = vadd.f32 %v2473_v11, %v2371_v20 }
  0xff   : > { %v1837_v50 = vpop.f32.mrb[1].mxu0 }
 0x100   : > { %v685_v55 = vpop.f32.mrb[2].mxu0  ;;  %v2424_v50 = vsel %vm2396_vm10, 1.0, %v2076_v1 }
 0x101   : > { %v686_v57 = vadd.f32 %v2311_v46, %v685_v55  ;;  %v1838_v58 = vpop.f32.mrb[3].mxu0 }
 0x102   : > { %v2419_v36 = vpop.f32.mrb[4].mxu1 }
 0x103   : > { %824 = vst.msk [vmem:[#allocation2 + $0x18] sm:$0xff] %vm820_vm3, %v686_v57  ;;  %2854 = vst [vmem:[#allocation8_spill] sm:$0xff] %v2419_v36  ;;  %v2439_v55 = vpop.f32.mrb[5].mxu1  ;;  %v2443_v57 = vsel %vm874_vm12, 1.0, %v2076_v1 }
 0x104   : > { %2859 = vst [vmem:[#allocation9_spill] sm:$0xff] %v2439_v55  ;;  %v2445_v58 = vpop.f32.mrb[6].mxu1  ;;  %v1137_v6 = vmul.f32 %v2443_v57, %v1129_v49 }
 0x105   : > { %2860 = vst [vmem:[#allocation10_spill] sm:$0xff] %v2445_v58  ;;  %v2467_v7 = vpop.f32.mrb[7].mxu1 }
 0x106   : > { %v690_v16 = vpop.f32.mrb[4].mxu0  ;;  %2865 = vst [vmem:[#allocation11_spill] sm:$0xff] %v2467_v7  ;;  %v2518_v53 = vmul.f32 %v2502_v34, %v1137_v6 }
 0x107   : > { %v691_v22 = vadd.f32 %v2311_v46, %v690_v16  ;;  %v1841_v23 = vpop.f32.mrb[5].mxu0 }
 0x108   : > { %v693_v27 = vpop.f32.mrb[6].mxu0 }
 0x109   : > { %825 = vst.msk [vmem:[#allocation2 + $0x20] sm:$0xff] %vm820_vm3, %v691_v22  ;;  %v694_v32 = vadd.f32 %v2311_v46, %v693_v27  ;;  %v1842_v33 = vpop.f32.mrb[7].mxu0  ;;  %v2485_v27 = vsel %vm2435_vm1, 1.0, %v2076_v1 }
 0x10a   : > { %v901_v41 = vld [vmem:[#allocation2 + $0x17] sm:$0xff] }
 0x10b   : > { %v964_v42 = vld [vmem:[#allocation2 + $0x11] sm:$0xff]  ;;  %826 = vst.msk [vmem:[#allocation2 + $0x28] sm:$0xff] %vm820_vm3, %v694_v32  ;;  %v1001_v48 = vmul.f32 %v2298_v37, %v901_v41  ;;  %v909_v26 = vmul.f32 %v2369_v19, %v901_v41  ;;  %v2506_v41 = vmul.f32 %v2392_v30, %v1108_v5  ;;  %v2535_v5 = vadd.f32 %v2364_v14, %v2473_v11 }
 0x10c   : > { %v972_v45 = vmul.f32 %v2362_v13, %v964_v42  ;;  %v937_v15 = vld [vmem:[#allocation2 + $0x18] sm:$0xff] }
 0x10d   : > { %v1013_v17 = vmul.f32 %v2357_v12, %v1001_v48  ;;  %v921_v6 = vmul.f32 %v2301_v39, %v909_v26 }
 0x10e   : > { %v984_v56 = vmul.f32 %v2338_v2, %v972_v45  ;;  %v698_v62 = vpop.f32.mrb[8].mxu0  ;;  %v1034_v45 = vmul.f32 %v2327_v60, %v937_v15 }
 0x10f   : > { %v699_v8 = vadd.f32 %v2311_v46, %v698_v62  ;;  %v1845_v10 = vpop.f32.mrb[9].mxu0 }
 0x110   : > { %v992_v16 = vadd.f32 %v984_v56, %v956_v18  ;;  %v701_v22 = vpop.f32.mrb[10].mxu0  ;;  %v902_v23 = vld [vmem:[#allocation2 + $0x1f] sm:$0xff]  ;;  %v2490_v18 = vsel %vm2447_vm2, 1.0, %v2076_v1 }
 0x111   : > { %v965_v25 = vld [vmem:[#allocation2 + $0x19] sm:$0xff]  ;;  %827 = vst.msk [vmem:[#allocation2 + $0x30] sm:$0xff] %vm820_vm3, %v699_v8  ;;  %v702_v32 = vadd.f32 %v2311_v46, %v701_v22  ;;  %v1846_v33 = vpop.f32.mrb[11].mxu0  ;;  %v910_v35 = vmul.f32 %v2377_v24, %v902_v23  ;;  %v1080_v49 = vmul.f32 %v2298_v37, %v902_v23 }
 0x112   : > { %v1021_v38 = vadd.f32 %v1013_v17, %v992_v16  ;;  %v2508_v42 = vld [vmem:[#allocation2 + $0x27] sm:$0xff]  ;;  %v1051_v48 = vmul.f32 %v2362_v13, %v965_v25 }
 0x113   : > { %v2510_v1 = vld [vmem:[#allocation2 + $0x20] sm:$0xff]  ;;  %828 = vst.msk [vmem:[#allocation2 + $0x38] sm:$0xff] %vm820_vm3, %v702_v32  ;;  %v922_v54 = vmul.f32 %v2301_v39, %v910_v35  ;;  %v1003_v3 = vmul.f32 %v2377_v24, %v2508_v42  ;;  %v1092_v22 = vmul.f32 %v2405_v40, %v1080_v49  ;;  %v911_v26 = vmul.f32 %v2410_v43, %v2508_v42 }
 0x114   : > { %v2512_v44 = vld [vmem:[#allocation2 + $0x21] sm:$0xff]  ;;  %v1042_v62 = vadd.f32 %v1034_v45, %v1021_v38  ;;  %v1063_v37 = vmul.f32 %v2389_v29, %v1051_v48  ;;  %v950_v10 = vmul.f32 %v2314_v47, %v2510_v1  ;;  %v949_v45 = vmul.f32 %v2314_v47, %v937_v15 }
 0x115   : > { %v974_v56 = vmul.f32 %v2386_v28, %v2512_v44  ;;  %v930_v8 = vadd.f32 %v2321_v51, %v922_v54  ;;  %v1130_v14 = vmul.f32 %v2362_v13, %v2512_v44  ;;  %v2557_v54 = vld [vmem:[#allocation2 + $0x28] sm:$0xff]  ;;  %v1113_v13 = vmul.f32 %v2392_v30, %v2510_v1 }
 0x116   : > { %v706_v16 = vpop.f32.mrb[12].mxu0  ;;  %v1071_v17 = vadd.f32 %v1063_v37, %v1042_v62  ;;  %v923_v37 = vmul.f32 %v2301_v39, %v911_v26  ;;  %v1002_v26 = vmul.f32 %v2369_v19, %v902_v23 }
 0x117   : > { %v707_v32 = vadd.f32 %v2311_v46, %v706_v16  ;;  %v1849_v33 = vpop.f32.mrb[13].mxu0  ;;  %v958_v35 = vadd.f32 %v950_v10, %v930_v8  ;;  %v986_v38 = vmul.f32 %v2338_v2, %v974_v56  ;;  %v929_v16 = vadd.f32 %v2321_v51, %v921_v6 }
 0x118   : > { %v709_v20 = vpop.f32.mrb[14].mxu0  ;;  %v2555_v48 = vld [vmem:[#allocation2 + $0x2f] sm:$0xff]  ;;  %v1100_v62 = vadd.f32 %v1092_v22, %v1071_v17  ;;  %v1015_v10 = vmul.f32 %v2357_v12, %v1003_v3  ;;  %v973_v33 = vmul.f32 %v2429_v52, %v965_v25  ;;  %v1142_v7 = vmul.f32 %v2502_v34, %v1130_v14 }
 0x119   : > { %v2559_v49 = vld [vmem:[#allocation2 + $0x29] sm:$0xff]  ;;  %829 = vst.msk [vmem:[#allocation2 + $0x40] sm:$0xff] %vm820_vm3, %v707_v32  ;;  %v710_v56 = vadd.f32 %v2311_v46, %v709_v20  ;;  %v1850_v15 = vpop.f32.mrb[15].mxu0  ;;  %v994_v8 = vadd.f32 %v986_v38, %v958_v35  ;;  %v1036_v32 = vmul.f32 %v2327_v60, %v2557_v54  ;;  %v1082_v35 = vmul.f32 %v2377_v24, %v2555_v48 }
 0x11a   : > { %v1053_v17 = vmul.f32 %v2386_v28, %v2559_v49  ;;  %v1121_v22 = vadd.f32 %v1113_v13, %v1100_v62  ;;  %v931_v3 = vadd.f32 %v2321_v51, %v923_v37  ;;  %v951_v25 = vmul.f32 %v2314_v47, %v2557_v54  ;;  %v2581_v38 = vld [vmem:[#allocation2 + $0x31] sm:$0xff] }
 0x11b   : > { %830 = vst.msk [vmem:[#allocation2 + $0x48] sm:$0xff] %vm820_vm3, %v710_v56  ;;  %v1023_v6 = vadd.f32 %v1015_v10, %v994_v8  ;;  %v975_v23 = vmul.f32 %v2424_v50, %v2559_v49  ;;  %v957_v14 = vadd.f32 %v949_v45, %v929_v16  ;;  %v940_v62 = vld [vmem:[#allocation2 + $0x30] sm:$0xff]  ;;  %v1004_v24 = vmul.f32 %v2410_v43, %v2555_v48 }
 0x11c   : > { %v2583_v20 = vadd.f32 %v1142_v7, %v1121_v22  ;;  %v1065_v56 = vmul.f32 %v2389_v29, %v1053_v17  ;;  %v985_v37 = vmul.f32 %v2338_v2, %v973_v33  ;;  %v959_v10 = vadd.f32 %v951_v25, %v931_v3 }
 0x11d   : > { %v1044_v13 = vadd.f32 %v1036_v32, %v1023_v6  ;;  %v987_v7 = vmul.f32 %v2338_v2, %v975_v23  ;;  %v1014_v22 = vmul.f32 %v2357_v12, %v1002_v26  ;;  %v1094_v6 = vmul.f32 %v2405_v40, %v1082_v35  ;;  %v2598_v32 = vld [vmem:[#allocation2 + $0x37] sm:$0xff] }
 0x11e   : > { %v714_v15 = vpop.f32.mrb[16].mxu0  ;;  %v1278_v8 = vmul.f32 0.70710677, %v2583_v20  ;;  %v1132_v17 = vmul.f32 %v2386_v28, %v2581_v38  ;;  %v1037_v58 = vmul.f32 %v2327_v60, %v940_v62  ;;  %v1016_v3 = vmul.f32 %v2357_v12, %v1004_v24  ;;  %v941_v23 = vld [vmem:[#allocation2 + $0x38] sm:$0xff] }
 0x11f   : > { %v715_v55 = vadd.f32 %v2311_v46, %v714_v15  ;;  %v1853_v45 = vpop.f32.mrb[17].mxu0  ;;  %v1073_v16 = vadd.f32 %v1065_v56, %v1044_v13  ;;  %v995_v36 = vadd.f32 %v987_v7, %v959_v10  ;;  %v1054_v26 = vmul.f32 %v2424_v50, %v2581_v38 }
 0x120   : > { %v717_v33 = vpop.f32.mrb[18].mxu0  ;;  %v1115_v35 = vmul.f32 %v2392_v30, %v940_v62  ;;  %1980 = verf.f32 %v1278_v8  ;;  %v993_v28 = vadd.f32 %v985_v37, %v957_v14  ;;  %v1083_v56 = vmul.f32 %v2410_v43, %v2598_v32  ;;  %v2612_v10 = vld [vmem:[#allocation2 + $0x3f] sm:$0xff] }
 0x121   : > { %831 = vst.msk [vmem:[#allocation2 + $0x50] sm:$0xff] %vm820_vm3, %v715_v55  ;;  %v1854_v46 = vpop.f32.mrb[19].mxu0  ;;  %v1102_v25 = vadd.f32 %v1094_v6, %v1073_v16  ;;  %v1024_v13 = vadd.f32 %v1016_v3, %v995_v36  ;;  %v1052_v15 = vmul.f32 %v2429_v52, %v2512_v44  ;;  %v1081_v24 = vmul.f32 %v2369_v19, %v2508_v42  ;;  %v2615_v45 = vld [vmem:[#allocation2 + $0x39] sm:$0xff] }
 0x122   : > { %v1144_v7 = vmul.f32 %v2502_v34, %v1132_v17  ;;  %v1022_v8 = vadd.f32 %v1014_v22, %v993_v28  ;;  %v1035_v36 = vmul.f32 %v2327_v60, %v2510_v1  ;;  %v2620_v14 = vmul.f32 %v2314_v47, %v940_v62  ;;  %v2627_v17 = vld [vmem:[#allocation2 + $0x40] sm:$0xff] }
 0x123   : > { %v1123_v55 = vadd.f32 %v1115_v35, %v1102_v25  ;;  %v1045_v43 = vadd.f32 %v1037_v58, %v1024_v13  ;;  %v1066_v44 = vmul.f32 %v2389_v29, %v1054_v26  ;;  %v1116_v37 = vmul.f32 %v2392_v30, %v941_v23  ;;  %v2629_v22 = vld [vmem:[#allocation2 + $0x41] sm:$0xff] }
 0x124   : > { %v1043_v42 = vadd.f32 %v1035_v36, %v1022_v8  ;;  %v1064_v16 = vmul.f32 %v2389_v29, %v1052_v15  ;;  %v914_v6 = vmul.f32 %v2456_v63, %v2612_v10  ;;  %v1095_v62 = vmul.f32 %v2405_v40, %v1083_v56  ;;  %v2635_v3 = vld [vmem:[#allocation2 + $0x47] sm:$0xff] }
 0x125   : > { %v1152_v19 = vadd.f32 %v1144_v7, %v1123_v55  ;;  %v1074_v1 = vadd.f32 %v1066_v44, %v1045_v43  ;;  %v1133_v58 = vmul.f32 %v2424_v50, %v2615_v45  ;;  %v1093_v33 = vmul.f32 %v2405_v40, %v1081_v24 }
 0x126   : > { %v1072_v46 = vadd.f32 %v1064_v16, %v1043_v42  ;;  %v1131_v25 = vmul.f32 %v2429_v52, %v2559_v49  ;;  %v926_v35 = vmul.f32 %v2301_v39, %v914_v6  ;;  %v1114_v13 = vmul.f32 %v2392_v30, %v2557_v54  ;;  %v2657_v42 = vld [vmem:[#allocation2 + $0x48] sm:$0xff] }
 0x127   : > { %v1280_v26 = vmul.f32 0.70710677, %v1152_v19  ;;  %v1103_v28 = vadd.f32 %v1095_v62, %v1074_v1  ;;  %v954_v56 = vmul.f32 %v2314_v47, %v2627_v17  ;;  %v978_v50 = vmul.f32 %v2485_v27, %v2629_v22 }
 0x128   : > { %v1101_v15 = vadd.f32 %v1093_v33, %v1072_v46  ;;  %v934_v24 = vadd.f32 %v2321_v51, %v926_v35  ;;  %v2647_v55 = vld [vmem:[#allocation2 + $0x49] sm:$0xff]  ;;  %v1007_v52 = vmul.f32 %v2456_v63, %v2635_v3  ;;  %v1270_v49 = vmul.f32 0.5, %v2583_v20  ;;  %v1079_v11 = vld [vmem:[#allocation2 + $0x57] sm:$0xff] }
 0x129   : > { %1982 = verf.f32 %v1280_v26  ;;  %v2653_v7 = vmul.f32 %v2314_v47, %v941_v23  ;;  %v1124_v54 = vadd.f32 %v1116_v37, %v1103_v28  ;;  %v1145_v8 = vmul.f32 %v2502_v34, %v1133_v58  ;;  %v1000_v58 = vld [vmem:[#allocation2 + $0x4f] sm:$0xff] }
 0x12a   : > { %v1981_v36 = vpop.eup %1980  ;;  %v1122_v43 = vadd.f32 %v1114_v13, %v1101_v15  ;;  %v1143_v44 = vmul.f32 %v2502_v34, %v1131_v25  ;;  %v962_v16 = vadd.f32 %v954_v56, %v934_v24  ;;  %v990_v6 = vmul.f32 %v2338_v2, %v978_v50  ;;  %v1029_v15 = vld [vmem:[#allocation2 + $0x50] sm:$0xff] }
 0x12b   : > { %v2661_v1 = vmul.f32 %v2327_v60, %v941_v23  ;;  %v1153_v62 = vadd.f32 %v1145_v8, %v1124_v54  ;;  %v915_v20 = vmul.f32 %v2479_v21, %v2635_v3  ;;  %v979_v37 = vmul.f32 %v2443_v57, %v2647_v55  ;;  %v1050_v54 = vld [vmem:[#allocation2 + $0x51] sm:$0xff] }
 0x12c   : > { %v1151_v33 = vadd.f32 %v1143_v44, %v1122_v43  ;;  %v998_v26 = vadd.f32 %v990_v6, %v962_v16  ;;  %v1019_v46 = vmul.f32 %v2357_v12, %v1007_v52  ;;  %v1057_v25 = vmul.f32 %v2485_v27, %v2647_v55 }
 0x12d   : > { %v1272_v35 = vmul.f32 0.5, %v1152_v19  ;;  %v1294_v28 = vadd.f32 1.0, %v1981_v36  ;;  %v1281_v13 = vmul.f32 0.70710677, %v1153_v62  ;;  %v955_v23 = vmul.f32 %v2314_v47, %v2657_v42 }
 0x12e   : > { %v1279_v56 = vmul.f32 0.70710677, %v1151_v33  ;;  %v1027_v50 = vadd.f32 %v1019_v46, %v998_v26  ;;  %v1040_v24 = vmul.f32 %v2327_v60, %v2657_v42  ;;  %v1086_v8 = vmul.f32 %v2456_v63, %v1000_v58 }
 0x12f   : > { %1984 = verf.f32 %v1281_v13  ;;  %v927_v52 = vmul.f32 %v2301_v39, %v915_v20  ;;  %v991_v43 = vmul.f32 %v2338_v2, %v979_v37  ;;  %v1008_v19 = vmul.f32 %v2479_v21, %v1000_v58 }
 0x130   : > { %1986 = verf.f32 %v1279_v56  ;;  %v1048_v36 = vadd.f32 %v1040_v24, %v1027_v50  ;;  %v1069_v47 = vmul.f32 %v2389_v29, %v1057_v25  ;;  %v912_v44 = vmul.f32 %v2461_v0, %v2555_v48 }
 0x131   : > { %v1302_v16 = vmul.f32 %v1294_v28, %v1270_v49  ;;  %v1041_v6 = vmul.f32 %v2327_v60, %v1029_v15  ;;  %v1058_v26 = vmul.f32 %v2443_v57, %v1050_v54  ;;  %v1136_v63 = vmul.f32 %v2485_v27, %v1050_v54 }
 0x132   : > { %v1077_v20 = vadd.f32 %v1069_v47, %v1048_v36  ;;  %v1098_v37 = vmul.f32 %v2405_v40, %v1086_v8  ;;  %v924_v58 = vmul.f32 %v2301_v39, %v912_v44  ;;  %v976_v13 = vmul.f32 %v2464_v4, %v2581_v38 }
 0x133   : > { %v1983_v46 = vpop.eup %1982  ;;  %v1119_v25 = vmul.f32 %v2392_v30, %v1029_v15  ;;  %v1005_v48 = vmul.f32 %v2461_v0, %v2598_v32  ;;  %v1055_v49 = vmul.f32 %v2464_v4, %v2615_v45  ;;  %v1084_v57 = vmul.f32 %v2461_v0, %v2612_v10 }
 0x134   : > { %v1296_v27 = vadd.f32 1.0, %v1983_v46  ;;  %v1106_v28 = vadd.f32 %v1098_v37, %v1077_v20  ;;  %v932_v56 = vadd.f32 %v2321_v51, %v924_v58  ;;  %v935_v50 = vadd.f32 %v2321_v51, %v927_v52 }
 0x135   : > { %v1310_v24 = vmul.f32 %v1302_v16, %v2530_v61  ;;  %v1273_v38 = vmul.f32 0.5, %v1153_v62  ;;  %v1271_v54 = vmul.f32 0.5, %v1151_v33  ;;  %v1148_v15 = vmul.f32 %v2502_v34, %v1136_v63 }
 0x136   : > { %v1127_v8 = vadd.f32 %v1119_v25, %v1106_v28  ;;  %v960_v36 = vadd.f32 %v2620_v14, %v932_v56  ;;  %v988_v47 = vmul.f32 %v2338_v2, %v976_v13  ;;  %v963_v44 = vadd.f32 %v955_v23, %v935_v50 }
 0x137   : > { %v1017_v0 = vmul.f32 %v2357_v12, %v1005_v48  ;;  %v1067_v46 = vmul.f32 %v2389_v29, %v1055_v49  ;;  %v913_v52 = vmul.f32 %v2490_v18, %v2598_v32  ;;  %v977_v61 = vmul.f32 %v2495_v31, %v2615_v45 }
 0x138   : > { %v1304_v62 = vmul.f32 %v1296_v27, %v1272_v35  ;;  %v996_v33 = vadd.f32 %v988_v47, %v960_v36  ;;  %v1096_v16 = vmul.f32 %v2405_v40, %v1084_v57  ;;  %v999_v63 = vadd.f32 %v991_v43, %v963_v44 }
 0x139   : > { %v1985_v14 = vpop.eup %1984  ;;  %v1134_v23 = vmul.f32 %v2464_v4, %v2629_v22  ;;  %v1020_v20 = vmul.f32 %v2357_v12, %v1008_v19  ;;  %v1087_v37 = vmul.f32 %v2479_v21, %v1079_v11  ;;  %v925_v58 = vmul.f32 %v2301_v39, %v913_v52 }
 0x13a   : > { %v1987_v13 = vpop.eup %1986  ;;  %v1297_v32 = vadd.f32 1.0, %v1985_v14  ;;  %v1156_v25 = vadd.f32 %v1148_v15, %v1127_v8  ;;  %v1025_v48 = vadd.f32 %v1017_v0, %v996_v33  ;;  %v1006_v45 = vmul.f32 %v2490_v18, %v2612_v10 }
 0x13b   : > { %v1295_v35 = vadd.f32 1.0, %v1987_v13  ;;  %v1028_v49 = vadd.f32 %v1020_v20, %v999_v63  ;;  %v933_v43 = vadd.f32 %v2321_v51, %v925_v58  ;;  %v989_v57 = vmul.f32 %v2338_v2, %v977_v61 }
 0x13c   : > { %v1312_v4 = vmul.f32 %v1304_v62, %v2526_v59  ;;  %v1305_v19 = vmul.f32 %v1297_v32, %v1273_v38  ;;  %v1046_v11 = vadd.f32 %v2661_v1, %v1025_v48  ;;  %v1070_v39 = vmul.f32 %v2389_v29, %v1058_v26 }
 0x13d   : > { %v1303_v21 = vmul.f32 %v1295_v35, %v1271_v54  ;;  %v1049_v27 = vadd.f32 %v1041_v6, %v1028_v49  ;;  %v1099_v28 = vmul.f32 %v2405_v40, %v1087_v37  ;;  %v961_v56 = vadd.f32 %v2653_v7, %v933_v43  ;;  %v2870_v43 = vld [vmem:[#allocation9_spill] sm:$0xff] }
 0x13e   : > { %v1313_v10 = vmul.f32 %v1305_v19, %v2535_v5  ;;  %v1284_v50 = vmul.f32 0.70710677, %v1156_v25  ;;  %v1075_v15 = vadd.f32 %v1067_v46, %v1046_v11  ;;  %v1056_v51 = vmul.f32 %v2495_v31, %v2629_v22 }
 0x13f   : > { %v1311_v2 = vmul.f32 %v1303_v21, %v2545_v9  ;;  %v1078_v59 = vadd.f32 %v1070_v39, %v1049_v27  ;;  %v997_v38 = vadd.f32 %v989_v57, %v961_v56  ;;  %v1018_v1 = vmul.f32 %v2357_v12, %v1006_v45  ;;  %v2871_v57 = vld [vmem:[#allocation11_spill] sm:$0xff] }
 0x140   : > { %v1319_v26 = vpack.c.bf16 %v1313_v10, %v1312_v4  ;;  %v1104_v54 = vadd.f32 %v1096_v16, %v1075_v15  ;;  %v1117_v6 = vmul.f32 %v2392_v30, %v2627_v17  ;;  %v1039_v7 = vmul.f32 %v2327_v60, %v2627_v17  ;;  %v1751_v15 = vld [vmem:[%s2828_s11] ss:$0 sm:$0xff] }
 0x141   : > { %v1318_v5 = vpack.c.bf16 %v1311_v2, %v1310_v24  ;;  %v1107_v8 = vadd.f32 %v1099_v28, %v1078_v59  ;;  %v1026_v36 = vadd.f32 %v1018_v1, %v997_v38  ;;  %v1085_v22 = vmul.f32 %v2490_v18, %v2635_v3 }
 0x142   : > { %v1125_v47 = vadd.f32 %v1117_v6, %v1104_v54  ;;  %v1146_v9 = vmul.f32 %v2502_v34, %v1134_v23  ;;  %1988 = verf.f32 %v1284_v50  ;;  %v1068_v0 = vmul.f32 %v2389_v29, %v1056_v51 }
 0x143   : > { %1885 = vmatprep.mubr.msk.bf16.mxu1 %vm820_vm3, %v1318_v5  ;;  %v1128_v12 = vadd.f32 %v2506_v41, %v1107_v8  ;;  %v1047_v44 = vadd.f32 %v1039_v7, %v1026_v36  ;;  %v1097_v24 = vmul.f32 %v2405_v40, %v1085_v22  ;;  %v1135_v18 = vmul.f32 %v2495_v31, %v2647_v55  ;;  %v2867_v31 = vld [vmem:[#allocation12_spill] sm:$0xff] }
 0x144   : > { %v1154_v46 = vadd.f32 %v1146_v9, %v1125_v47  ;;  %1886 = vmatmul.mubr.msk.bf16.vlgmr.msra.gmra.mrb[8].mxu1 %vm820_vm3, %v1319_v26  ;;  %v1118_v41 = vmul.f32 %v2392_v30, %v2657_v42  ;;  %v1276_v14 = vmul.f32 0.5, %v1156_v25  ;;  %v2868_v55 = vld [vmem:[#allocation8_spill] sm:$0xff]  ;;  %v2869_v42 = vld [vmem:[#allocation10_spill] sm:$0xff]  ;;  %v1256_v25 = vadd.f32 %v2867_v31, %v2870_v43 }
 0x145   : > { %v1157_v60 = vadd.f32 %v2518_v53, %v1128_v12  ;;  %v1076_v17 = vadd.f32 %v1068_v0, %v1047_v44  ;;  %v1147_v62 = vmul.f32 %v2502_v34, %v1135_v18  ;;  %v1264_v20 = vadd.f32 %v2868_v55, %v2867_v31 }
 0x146   : > { %v1282_v3 = vmul.f32 0.70710677, %v1154_v46  ;;  %v1267_v32 = vadd.f32 %v2869_v42, %v2867_v31  ;;  %v1274_v45 = vmul.f32 0.5, %v1154_v46  ;;  %v1259_v4 = vadd.f32 %v2867_v31, %v2871_v57 }
 0x147   : > { %v1285_v52 = vmul.f32 0.70710677, %v1157_v60  ;;  %v1105_v61 = vadd.f32 %v1097_v24, %v1076_v17  ;;  %v1277_v58 = vmul.f32 0.5, %v1157_v60 }
 0x148   : > { %1990 = verf.f32 %v1282_v3 }
 0x149   : > { %1992 = verf.f32 %v1285_v52  ;;  %v1126_v29 = vadd.f32 %v1118_v41, %v1105_v61 }
 0x14b   : > { %v1155_v33 = vadd.f32 %v1147_v62, %v1126_v29 }
 0x14c   : > { %v1989_v16 = vpop.eup %1988 }
 0x14d   : > { %v1283_v53 = vmul.f32 0.70710677, %v1155_v33  ;;  %v1300_v63 = vadd.f32 1.0, %v1989_v16  ;;  %v1275_v39 = vmul.f32 0.5, %v1155_v33 }
 0x14f   : > { %1994 = verf.f32 %v1283_v53  ;;  %v1308_v37 = vmul.f32 %v1300_v63, %v1276_v14 }
 0x151   : > { %v1316_v34 = vmul.f32 %v1308_v37, %v1264_v20 }
 0x152   : > { %v1991_v40 = vpop.eup %1990 }
 0x153   : > { %v1993_v23 = vpop.eup %1992  ;;  %v1298_v30 = vadd.f32 1.0, %v1991_v40 }
 0x154   : > { %v1301_v13 = vadd.f32 1.0, %v1993_v23 }
 0x155   : > { %v1306_v19 = vmul.f32 %v1298_v30, %v1274_v45 }
 0x156   : > { %v1309_v48 = vmul.f32 %v1301_v13, %v1277_v58 }
 0x157   : > { %v1314_v28 = vmul.f32 %v1306_v19, %v1256_v25 }
 0x158   : > { %v1317_v35 = vmul.f32 %v1309_v48, %v1267_v32 }
 0x159   : > { %v1995_v49 = vpop.eup %1994 }
 0x15a   : > { %v1321_v11 = vpack.c.bf16 %v1317_v35, %v1316_v34  ;;  %v1299_v21 = vadd.f32 1.0, %v1995_v49 }
 0x15c   : > { %v1307_v27 = vmul.f32 %v1299_v21, %v1275_v39 }
 0x15e   : > { %v1315_v56 = vmul.f32 %v1307_v27, %v1259_v4 }
 0x160   : > { %v1320_v10 = vpack.c.bf16 %v1315_v56, %v1314_v28 }
 0x162   : > { %1889 = vmatprep.mubr.msk.bf16.mxu1 %vm820_vm3, %v1320_v10 }
 0x163   : > { %1890 = vmatmul.mubr.msk.bf16.gmra.mrb[12].mxu1 %vm820_vm3, %v1321_v11 }
 0x217   : > { %v1887_v50 = vpop.f32.mrb[8].mxu1 }
 0x218   : > { %v1465_v51 = vpop.f32.mrb[9].mxu1  ;;  %v1505_v59 = vadd.f32 %v1887_v50, %v1751_v15 }
 0x219   : > { %v1888_v2 = vpop.f32.mrb[10].mxu1  ;;  %v1503_v26 = vadd.f32 %v1751_v15, %v1465_v51 }
 0x21a   : > { %v1506_v38 = vadd.f32 %v1888_v2, %v1751_v15  ;;  %v1468_v1 = vpop.f32.mrb[11].mxu1 }
 0x21b   : > { %v1504_v54 = vadd.f32 %v1751_v15, %v1468_v1 }
 0x21c   : > { %v1786_v6 = vpack.c.bf16 %v1506_v38, %v1505_v59 }
 0x21d   : > { %v1781_v7 = vpack.c.bf16 %v1504_v54, %v1503_v26 }
 0x21e   : > { %1799 = vst [vmem:[%s517_s3 + $0x8] sm:$0xff] %v1786_v6  }
 0x21f   : > { %1782 = vst [vmem:[%s517_s3] sm:$0xff] %v1781_v7  }
 0x236   : > { %v1891_v5 = vpop.f32.mrb[12].mxu1 }
 0x237   : > { %v1481_v8 = vpop.f32.mrb[13].mxu1  ;;  %v1509_v22 = vadd.f32 %v1891_v5, %v1751_v15 }
 0x238   : > { %v1892_v36 = vpop.f32.mrb[14].mxu1  ;;  %v1507_v12 = vadd.f32 %v1751_v15, %v1481_v8 }
 0x239   : > { %v1510_v47 = vadd.f32 %v1892_v36, %v1751_v15  ;;  %v1484_v9 = vpop.f32.mrb[15].mxu1 }
 0x23a   : > { %v1508_v44 = vadd.f32 %v1751_v15, %v1484_v9 }
 0x23b   : > { %v1796_v0 = vpack.c.bf16 %v1510_v47, %v1509_v22 }
 0x23c   : > { %v1791_v46 = vpack.c.bf16 %v1508_v44, %v1507_v12 }
 0x23d   : > { %1801 = vst [vmem:[%s517_s3 + $0x18] sm:$0xff] %v1796_v0  }
 0x23e   : > { %1800 = vst [vmem:[%s517_s3 + $0x10] sm:$0xff] %v1791_v46  }
 0x23f   : > { %2009 = shalt.err (!%p2006_p5)
}
 0x240   : > { %s2010_s25 = scalar_lea.hbm %s2767_s17, 512  ;;  %s2014_s28 = scalar_lea.hbm %s2829_s12, 1024 }
 0x241   : > { %p2011_p6 = scmp.ne.s32.totalorder %s2767_s17, %s2010_s25  ;;  %p2015_p10 = scmp.lt.u32.totalorder %s2767_s17, %s2829_s12 }
 0x242   : > { %p2016_p11 = scmp.lt.u32.totalorder %s2014_s28, %s2010_s25  ;;  %p2018_p13 = scmp.lt.u32.totalorder %s2010_s25, %s2767_s17 }
 0x243   : > { %p2012_p7 = pnand %p2011_p6, %p2186_p4 }
 0x244   : > { %p2017_p12 = por %p2016_p11, %p2015_p10 }
 0x245   : > { %p2013_p9 = pneg %p2012_p7 }
 0x246   : > { %p2019_p0 = por %p2018_p13, %p2017_p12 }
 0x248   : > { %p2020_p1 = pnand %p2019_p0, %p2013_p9 }
 0x24a   : > { %2023 = shalt.err (!%p2020_p1)
}
 0x24b   : > { %s2079_s24 = smov 64   ;;  %s2080_s30 = smov 4  }
 0x24c   : > { %1901 = dma.vmem_to_hbm [thread:$0]  (%p2186_p4), %s2762_s20, 512, %s2767_s17, %s2771_s18, %s2079_s24, %s2079_s24, %s2080_s30  }
 0x24d PF: > { %p1907_p2 = scmp.ge.s32.totalorder %s2074_s26, 2  ;;  %s1582_s19 = sand.u32 1, %s2054_s21  }
 0x24e   : > { %s1583_s25 = scalar_lea.sflag [#allocation4], %s1582_s19 }
 0x24f   : > { %p1904_p3 = pnand %p1907_p2, %p2193_p8 }
 0x251   : > { %2049 = dma.done.wait (!%p1904_p3), %s1583_s25, 512  }
 0x252   : > { %2051 = vsyncadd (!%p1904_p3), %s1583_s25, 4294966784  ;;  %s25_s26 = sadd.s32 1, %s2074_s26   ;;  %s2872_s24 = sld [smem:[#allocation6_spill]] }
 0x253   : > { %p22_p5 = scmp.ge.s32.totalorder %s25_s26, 4   ;;  %s2873_s25 = sld [smem:[#allocation7_spill]] }
 0x254   : > { %s2874_s21 = smov %s2058_s22  ;;  %s2875_s22 = smov %s2062_s23 }
 0x255   : > { %s2876_s23 = smov %s2199_s16  ;;  %24 = sbr.rel (!%p22_p5) target bundleno = 6 (0x6), region = 109 }
 0x25c   :  { %1588 = vsyncpa [#allocation4], 1 }
 0x25d   :  { %1590 = vsyncpa [#allocation4 + $0x1], 1 }

</bundles_post_ra>
